<compile_context>
chip_gen: v6e
topology: v6e:2x2x1
jax: 0.10.0
libtpu: 0.0.40
codegen_flags: <defaults>
</compile_context>

<pallas_src>
import functools

import jax
import jax.numpy as jnp
from jax import lax
from jax.experimental import pallas as pl
from jax.experimental.pallas import tpu as pltpu


_BLOCK_BYTES_BUDGET = 2 * 1024 * 1024  # ~2 MiB per block (per-step overhead amortized,
                                       # safe on every TPU generation's VMEM budget)


def _sublane_multiple(dtype) -> int:
    # f32 packs 8 rows per vreg sublane group, bf16 16, int8/fp8 32.
    return 8 * max(1, 4 // jnp.dtype(dtype).itemsize)


# ---------------------------------------------------------------------------
# channels_last: row-wise LayerNorm over the trailing C axis of a (rows, C) slab
# ---------------------------------------------------------------------------
def _ln_last_kernel(x_ref, w_ref, b_ref, o_ref, *, eps):
    x = x_ref[...].astype(jnp.float32)                       # (tm, C)
    mean = jnp.mean(x, axis=-1, keepdims=True)
    xc = x - mean
    var = jnp.mean(xc * xc, axis=-1, keepdims=True)          # biased var (matches torch)
    y = xc * lax.rsqrt(var + eps)
    y = y * w_ref[...] + b_ref[...]                          # (1, C) broadcast, pre-cast f32
    o_ref[...] = y.astype(o_ref.dtype)


def _layernorm_channels_last_2d(x2d, weight, bias, eps):
    rows, c = x2d.shape
    itemsize = jnp.dtype(x2d.dtype).itemsize
    sub = _sublane_multiple(x2d.dtype)

    tm = max(sub, (_BLOCK_BYTES_BUDGET // (c * itemsize)) // sub * sub)
    if tm >= rows:
        tm = rows                                            # full extent is always legal
    grid = (pl.cdiv(rows, tm),)                              # padded boundary block is OK:
                                                             # each row is independent

    w2d = weight.astype(jnp.float32).reshape(1, c)
    b2d = bias.astype(jnp.float32).reshape(1, c)

    return pl.pallas_call(
        functools.partial(_ln_last_kernel, eps=eps),
        out_shape=jax.ShapeDtypeStruct((rows, c), x2d.dtype),
        grid_spec=pltpu.PrefetchScalarGridSpec(
            num_scalar_prefetch=0,
            grid=grid,
            in_specs=[
                pl.BlockSpec((tm, c), lambda i: (i, 0)),
                pl.BlockSpec((1, c), lambda i: (0, 0)),
                pl.BlockSpec((1, c), lambda i: (0, 0)),
            ],
            out_specs=pl.BlockSpec((tm, c), lambda i: (i, 0)),
        ),
        compiler_params=pltpu.CompilerParams(
            dimension_semantics=("parallel",)),
    )(x2d, w2d, b2d)


# ---------------------------------------------------------------------------
# channels_first: native NCHW.  Block = (1, C, tile_hw); reduce over C (axis=1).
# ---------------------------------------------------------------------------
def _ln_first_kernel(x_ref, w_ref, b_ref, o_ref, *, eps):
    x = x_ref[...].astype(jnp.float32)                       # (1, C, T)
    mean = jnp.mean(x, axis=1, keepdims=True)                # channel reduction (sublanes)
    xc = x - mean
    var = jnp.mean(xc * xc, axis=1, keepdims=True)
    y = xc * lax.rsqrt(var + eps)
    y = y * w_ref[...] + b_ref[...]                          # (1, C, 1) broadcast
    o_ref[...] = y.astype(o_ref.dtype)


def _layernorm_channels_first(x, weight, bias, eps):
    b, c, h, w = x.shape
    hw = h * w
    x3d = x.reshape(b, c, hw)                                # free (contiguous) reshape
    itemsize = jnp.dtype(x.dtype).itemsize

    thw = max(128, (_BLOCK_BYTES_BUDGET // (c * itemsize)) // 128 * 128)
    if thw >= hw:
        thw = hw                                             # full extent is always legal
    grid = (b, pl.cdiv(hw, thw))                             # padded lanes masked on store

    w3d = weight.astype(jnp.float32).reshape(1, c, 1)
    b3d = bias.astype(jnp.float32).reshape(1, c, 1)

    y3d = pl.pallas_call(
        functools.partial(_ln_first_kernel, eps=eps),
        out_shape=jax.ShapeDtypeStruct((b, c, hw), x.dtype),
        grid_spec=pltpu.PrefetchScalarGridSpec(
            num_scalar_prefetch=0,
            grid=grid,
            in_specs=[
                pl.BlockSpec((1, c, thw), lambda bi, j: (bi, 0, j)),
                pl.BlockSpec((1, c, 1), lambda bi, j: (0, 0, 0)),
                pl.BlockSpec((1, c, 1), lambda bi, j: (0, 0, 0)),
            ],
            out_specs=pl.BlockSpec((1, c, thw), lambda bi, j: (bi, 0, j)),
        ),
        compiler_params=pltpu.CompilerParams(
            dimension_semantics=("parallel", "parallel")),
    )(x3d, w3d, b3d)
    return y3d.reshape(b, c, h, w)


# ---------------------------------------------------------------------------
# Public entry point — matches opencd ConvNeXt LayerNorm.forward semantics.
# ---------------------------------------------------------------------------
def layer_norm(x, weight, bias, *, eps=1e-6, data_format="channels_last"):
    if data_format not in ("channels_last", "channels_first"):
        raise NotImplementedError

    if data_format == "channels_last":
        c = x.shape[-1]
        lead = x.shape[:-1]
        y2d = _layernorm_channels_last_2d(x.reshape(-1, c), weight, bias, eps)
        return y2d.reshape(*lead, c)
    else:
        return _layernorm_channels_first(x, weight, bias, eps)


def _reference(x, weight, bias, eps, data_format):
    if data_format == "channels_last":
        u = jnp.mean(x, axis=-1, keepdims=True)
        s = jnp.mean((x - u) ** 2, axis=-1, keepdims=True)
        xh = (x - u) / jnp.sqrt(s + eps)
        return xh * weight + bias
    else:
        u = jnp.mean(x, axis=1, keepdims=True)
        s = jnp.mean((x - u) ** 2, axis=1, keepdims=True)
        xh = (x - u) / jnp.sqrt(s + eps)
        return weight[None, :, None, None] * xh + bias[None, :, None, None]


if __name__ == "__main__":
    key = jax.random.PRNGKey(0)
    k1, k2 = jax.random.split(key)

    C = 4
    eps = 1e-6

    # Parameters as in the module's __init__ (deterministic).
    weight = jnp.ones((C,), dtype=jnp.float32)
    bias = jnp.zeros((C,), dtype=jnp.float32)

    # channels_first example (PyTorch NCHW conv layout): (B=2, C=4, H=16, W=16)
    x_cf = jax.random.normal(k1, (2, C, 16, 16), dtype=jnp.float32)
    y_cf = layer_norm(x_cf, weight, bias, eps=eps, data_format="channels_first")
    y_cf = jax.block_until_ready(y_cf)
    ref_cf = _reference(x_cf, weight, bias, eps, "channels_first")
    assert jnp.allclose(y_cf, ref_cf, atol=1e-5, rtol=1e-5)

    # channels_last example: (B=2, H=16, W=16, C=4)
    x_cl = jax.random.normal(k2, (2, 16, 16, C), dtype=jnp.float32)
    y_cl = layer_norm(x_cl, weight, bias, eps=eps, data_format="channels_last")
    y_cl = jax.block_until_ready(y_cl)
    ref_cl = _reference(x_cl, weight, bias, eps, "channels_last")
    assert jnp.allclose(y_cl, ref_cl, atol=1e-5, rtol=1e-5)

    print("KERNEL_OK")
</pallas_src>

<mosaic_0001>
module attributes {stable_mosaic.version = 11 : i64} {
  func.func @_ln_first_kernel(%arg0: i32, %arg1: i32, %arg2: memref<1x4x256xf32, #tpu.memory_space<vmem>>, %arg3: memref<1x4x1xf32, #tpu.memory_space<vmem>>, %arg4: memref<1x4x1xf32, #tpu.memory_space<vmem>>, %arg5: memref<1x4x256xf32, #tpu.memory_space<vmem>>) attributes {dimension_semantics = [#tpu.dimension_semantics<parallel>, #tpu.dimension_semantics<parallel>], iteration_bounds = array<i64: 2, 1>, scalar_prefetch = 0 : i64, scratch_operands = 0 : i64, tpu.core_type = #tpu.core_type<tc>, window_params = [{transform_indices = @transform_0, window_bounds = array<i64: 1, 4, 256>}, {pipeline_mode = #tpu.pipeline_mode<synchronous>, transform_indices = @transform_1, window_bounds = array<i64: 1, 4, 1>}, {pipeline_mode = #tpu.pipeline_mode<synchronous>, transform_indices = @transform_2, window_bounds = array<i64: 1, 4, 1>}, {transform_indices = @transform_3, window_bounds = array<i64: 1, 4, 256>}]} {
    %c0 = arith.constant 0 : index
    %c0_0 = arith.constant 0 : index
    %c0_1 = arith.constant 0 : index
    %0 = vector.load %arg2[%c0, %c0_0, %c0_1] : memref<1x4x256xf32, #tpu.memory_space<vmem>>, vector<1x4x256xf32>
    %cst = arith.constant dense<0.000000e+00> : vector<1x256xf32>
    %1 = vector.multi_reduction <add>, %0, %cst [1] : vector<1x4x256xf32> to vector<1x256xf32>
    %2 = vector.shape_cast %1 : vector<1x256xf32> to vector<1x1x256xf32>
    %cst_2 = arith.constant 4.000000e+00 : f32
    %3 = vector.broadcast %cst_2 : f32 to vector<1x1x256xf32>
    %4 = arith.divf %2, %3 : vector<1x1x256xf32>
    %5 = vector.broadcast %4 : vector<1x1x256xf32> to vector<1x4x256xf32>
    %6 = arith.subf %0, %5 : vector<1x4x256xf32>
    %7 = arith.mulf %6, %6 : vector<1x4x256xf32>
    %cst_3 = arith.constant dense<0.000000e+00> : vector<1x256xf32>
    %8 = vector.multi_reduction <add>, %7, %cst_3 [1] : vector<1x4x256xf32> to vector<1x256xf32>
    %9 = vector.shape_cast %8 : vector<1x256xf32> to vector<1x1x256xf32>
    %cst_4 = arith.constant 4.000000e+00 : f32
    %10 = vector.broadcast %cst_4 : f32 to vector<1x1x256xf32>
    %11 = arith.divf %9, %10 : vector<1x1x256xf32>
    %cst_5 = arith.constant 9.99999997E-7 : f32
    %12 = vector.broadcast %cst_5 : f32 to vector<1x1x256xf32>
    %13 = arith.addf %11, %12 : vector<1x1x256xf32>
    %14 = math.rsqrt %13 : vector<1x1x256xf32>
    %15 = vector.broadcast %14 : vector<1x1x256xf32> to vector<1x4x256xf32>
    %16 = arith.mulf %6, %15 : vector<1x4x256xf32>
    %c0_6 = arith.constant 0 : index
    %c0_7 = arith.constant 0 : index
    %c0_8 = arith.constant 0 : index
    %17 = vector.load %arg3[%c0_6, %c0_7, %c0_8] : memref<1x4x1xf32, #tpu.memory_space<vmem>>, vector<1x4x1xf32>
    %18 = vector.broadcast %17 : vector<1x4x1xf32> to vector<1x4x256xf32>
    %19 = arith.mulf %16, %18 : vector<1x4x256xf32>
    %c0_9 = arith.constant 0 : index
    %c0_10 = arith.constant 0 : index
    %c0_11 = arith.constant 0 : index
    %20 = vector.load %arg4[%c0_9, %c0_10, %c0_11] : memref<1x4x1xf32, #tpu.memory_space<vmem>>, vector<1x4x1xf32>
    %21 = vector.broadcast %20 : vector<1x4x1xf32> to vector<1x4x256xf32>
    %22 = arith.addf %19, %21 : vector<1x4x256xf32>
    %c0_12 = arith.constant 0 : index
    %c0_13 = arith.constant 0 : index
    %c0_14 = arith.constant 0 : index
    %23 = vector.load %arg5[%c0_12, %c0_13, %c0_14] : memref<1x4x256xf32, #tpu.memory_space<vmem>>, vector<1x4x256xf32>
    tpu.vector_store %arg5[%c0_12, %c0_13, %c0_14], %22 {strides = array<i32>} : memref<1x4x256xf32, #tpu.memory_space<vmem>>, vector<1x4x256xf32>,
    return
  }
  func.func @transform_0(%arg0: i32, %arg1: i32) -> (i32, i32, i32) {
    %c0_i32 = arith.constant 0 : i32
    %c0_i32_0 = arith.constant 0 : i32
    return %arg0, %c0_i32, %arg1 : i32, i32, i32
  }
  func.func @transform_1(%arg0: i32, %arg1: i32) -> (i32, i32, i32) {
    %c0_i32 = arith.constant 0 : i32
    %c0_i32_0 = arith.constant 0 : i32
    %c0_i32_1 = arith.constant 0 : i32
    %c0_i32_2 = arith.constant 0 : i32
    return %c0_i32, %c0_i32_0, %c0_i32_1 : i32, i32, i32
  }
  func.func @transform_2(%arg0: i32, %arg1: i32) -> (i32, i32, i32) {
    %c0_i32 = arith.constant 0 : i32
    %c0_i32_0 = arith.constant 0 : i32
    %c0_i32_1 = arith.constant 0 : i32
    %c0_i32_2 = arith.constant 0 : i32
    return %c0_i32, %c0_i32_0, %c0_i32_1 : i32, i32, i32
  }
  func.func @transform_3(%arg0: i32, %arg1: i32) -> (i32, i32, i32) {
    %c0_i32 = arith.constant 0 : i32
    %c0_i32_0 = arith.constant 0 : i32
    return %arg0, %c0_i32, %arg1 : i32, i32, i32
  }
}

</mosaic_0001>

<bundles_post_ra>
// kernel: tpu_custom_call.1
= control target key start
LH: loop header
LB: loop body
LE: loop exit
PB: predicated region body
PF: predicated region fallthrough
CT: control target
= control target key end

     0   :  { %8 = vsyncpa [#allocation3], 0  ;;  %s762_s0 = inlined_call_operand.hbm [shape: f32[2,4,256], index: 0, kind: input, shape index: {}]   ;;  %s763_s1 = inlined_call_operand.vmem [shape: f32[1,4,1], index: 1, kind: input, shape index: {}]   ;;  %s764_s2 = inlined_call_operand.vmem [shape: f32[1,4,1], index: 2, kind: input, shape index: {}]   ;;  %s765_s3 = inlined_call_operand.hbm [shape: f32[2,4,256], index: 3, kind: output, shape index: {}]  }
   0x1   :  { %10 = vsyncpa [#allocation3 + $0x1], 0 }
   0x2   :  { %11 = vsyncpa [#allocation4], 0 }
   0x3   :  { %13 = vsyncpa [#allocation4 + $0x1], 0  ;;  %s614_s12 = smov 0   ;;  %s616_s13 = smov 0  }
   0x4   :  { %s618_s14 = smov 0   ;;  %s620_s15 = smov 0  }
   0x5   :  { %s622_s16 = smov 0   ;;  %s624_s17 = smov 0  }
   0x6 LB: > { %s393_s18 = sadd.s32 4294967295, %s588_s17   ;;  %s394_s19 = sadd.s32 4294967294, %s588_s17   ;;  %s588_s17 = sphi %s624_s17, %s19_s17   ;;  %s584_s16 = sphi %s622_s16, %s777_s16   ;;  %s580_s15 = sphi %s620_s15, %s776_s15   ;;  %s576_s14 = sphi %s618_s14, %s775_s14   ;;  %s572_s13 = sphi %s616_s13, %s774_s13   ;;  %s568_s12 = sphi %s614_s12, %s773_s12  }
   0x7   : > { %s31_s20 = sadd.s32 1, %s584_s16  ;;  %s40_s21 = sadd.s32 1, %s576_s14 }
   0x8   : > { %p33_p0 = scmp.ge.s32.totalorder %s31_s20, 2  ;;  %p47_p1 = scmp.ne.s32.totalorder %s576_s14, %s572_s13 }
   0x9   : > { %p48_p2 = scmp.eq.s32.totalorder %s588_s17, 0  ;;  %p53_p3 = scmp.ne.s32.totalorder %s572_s13, %s568_s12 }
   0xa   : > { %s779_s20 = smov (%p33_p0, %s31_s20), 0  ;;  %p54_p5 = scmp.eq.s32.totalorder %s393_s18, 0 }
   0xb   : > { %p655_p4 = por %p48_p2, %p47_p1  ;;  %s35_s23 = ssub.s32 %s584_s16, %s779_s20 }
   0xc   : > { %p121_p6 = scmp.eq.s32.totalorder %s393_s18, 1  ;;  %p38_p7 = scmp.eq.s32.totalorder %s35_s23, 0 }
   0xd   : > { %p661_p8 = por %p54_p5, %p53_p3  ;;  %p127_p10 = scmp.eq.s32.totalorder %s394_s19, 1 }
   0xe   : > { %p665_p9 = por %p121_p6, %p47_p1  ;;  %p422_p13 = scmp.lt.s32.totalorder %s588_s17, 2 }
   0xf   : > { %s670_s26 = scalar_select %p38_p7, %s576_s14, %s40_s21  }
  0x10   : > { %p672_p11 = por %p127_p10, %p53_p3  ;;  %s153_s28 = sand.u32 1, %s576_s14  }
  0x11   : > { %s397_s29 = sshll.u32 %s153_s28, 3  ;;  %s408_s30 = sshll.u32 %s584_s16, 7 }
  0x12   : > { %s769_s27 = scalar_select %p672_p11, 1, 0 }
  0x13   : > { %s165_s6 = scalar_lea.hbm %s762_s0, %s408_s30  ;;  %s157_s7 = scalar_lea.vmem [#allocation2], %s397_s29 }
  0x14   : > { %s167_s8 = sshll.u32 %s157_s7, 4  ;;  %p685_p0 = pnand %p422_p13, %p655_p4  ;;  %s168_s8 = int_to_ptr.vmem [resolvable:$true] %s167_s8 }
  0x15   : > { %p400_p1 = scmp.ge.s32.totalorder %s588_s17, 1  ;;  %p172_p2 = scmp.lt.s32.totalorder %s588_s17, 3 }
  0x16   : > { %s154_s10 = scalar_lea.sflag [#allocation3], %s153_s28  ;;  %p482_p3 = pneg %p685_p0 }
  0x17   : > { %s493_s11 = scalar_lea.vmem %s168_s8, 128  ;;  %s590_s18 = smov [#allocation2]  }
  0x18   : > { %p494_p5 = scmp.ne.s32.totalorder %s168_s8, %s493_s11  ;;  %s498_s19 = sshll.u32 %s590_s18, 4  ;;  %s499_s19 = int_to_ptr.vmem [resolvable:$false] %s498_s19 }
  0x19   : > { %s500_s21 = scalar_lea.vmem %s499_s19, 256  ;;  %p501_p10 = scmp.lt.s32.totalorder %s168_s8, %s499_s19 }
  0x1a   : > { %p496_p6 = pnand %p494_p5, %p482_p3  ;;  %p502_p12 = scmp.lt.s32.totalorder %s500_s21, %s493_s11 }
  0x1c   : > { %p497_p7 = pneg %p496_p6  ;;  %p503_p4 = por %p502_p12, %p501_p10 }
  0x1e   : > { %p504_p13 = pnand %p503_p4, %p497_p7 }
  0x20   : > { %507 = shalt.err (!%p504_p13)
}
  0x21   : > { %417 = dma.hbm_to_vmem [thread:$0]  (!%p685_p0), %s165_s6, 128, %s168_s8, %s154_s10  }
  0x22   : > { %p173_p11 = pnand %p400_p1, %p172_p2 }
  0x23   : > { %s700_s22 = sand.u32 (!%p173_p11), 1, %s572_s13  }
  0x24   : > { %176 = sbr.rel (%p173_p11) target bundleno = 189 (0xbd), region = 32  ;;  %s401_s23 = sshll.u32 (!%p173_p11), %s700_s22, 3 }
  0x25   : > { %s179_s28 = scalar_lea.sflag (!%p173_p11), [#allocation3], %s700_s22  ;;  %s182_s29 = scalar_lea.vmem (!%p173_p11), [#allocation2], %s401_s23 }
  0x29   : > { %559 = dma.done.wait (%p661_p8), %s179_s28, 128  }
  0x2a   : > { %561 = vsyncadd (%p661_p8), %s179_s28, 4294967168  ;;  %v591_v0 = vmov 0   ;;  %v263_v1 = vld [vmem:[%s763_s1] sm:$0xf]  ;;  %vm211_vm0 = vcmask 1043456   ;;  %v271_v45 = vlaneseq  ;;  %s409_s24 = sshll.u32 %s580_s15, 7 }
  0x2b   : > { %474 = vset.pattern.permute.xlu0 %v591_v0  ;;  %v277_v2 = vld [vmem:[%s764_s2] sm:$0xf]  ;;  %v592_v43 = vmov 839922192   ;;  %s204_s7 = scalar_lea.vmem [#allocation5], %s401_s23  ;;  %s307_s11 = scalar_lea.hbm %s765_s3, %s409_s24 }
  0x2c   : > { %266 = vperm.xlu0 %474, %v263_v1   ;;  %v207_v3 = vld [vmem:[%s182_s29] sm:$0xff]  ;;  %v269_v44 = vunpack.c.l.s4 %v592_v43  ;;  %v272_v48 = vshrl.u32 %v271_v45, 7  ;;  %s309_s8 = sshll.u32 %s204_s7, 4  ;;  %s293_s18 = scalar_lea.sflag [#allocation4], %s700_s22  ;;  %s310_s8 = int_to_ptr.vmem [resolvable:$true] %s309_s8 }
  0x2d   : > { %v209_v4 = vcombine.high %v207_v3, %v207_v3  ;;  %v212_v5 = vsel %vm211_vm0, %v207_v3, 0.0  ;;  %s508_s19 = scalar_lea.vmem %s310_s8, 128  ;;  %s593_s21 = smov [#allocation5]  }
  0x2e   : > { %v213_v7 = vrot.slane %v212_v5, 4  ;;  %v270_v47 = vunpack.c.0.s8 %v269_v44  ;;  %p509_p8 = scmp.ne.s32.totalorder %s310_s8, %s508_s19  ;;  %s512_s15 = sshll.u32 %s593_s21, 4  ;;  %s513_s15 = int_to_ptr.vmem [resolvable:$false] %s512_s15 }
  0x2f   : > { %v219_v6 = vsel %vm211_vm0, %v209_v4, 0.0  ;;  %s514_s23 = scalar_lea.vmem %s513_s15, 256  ;;  %p515_p0 = scmp.lt.s32.totalorder %s310_s8, %s513_s15 }
  0x30   : > { %280 = vperm.xlu0 %474, %v277_v2   ;;  %v220_v8 = vrot.slane %v219_v6, 4  ;;  %v214_v9 = vadd.f32 %v213_v7, %v212_v5  ;;  %v273_v50 = vsub.s32 %v270_v47, %v272_v48  ;;  %p510_p11 = pnand %p509_p8, %p665_p9  ;;  %p516_p1 = scmp.lt.s32.totalorder %s514_s23, %s508_s19 }
  0x32   : > { %v221_v10 = vadd.f32 %v220_v8, %v219_v6  ;;  %v215_v11 = vrot.slane %v214_v9, 2  ;;  %p511_p12 = pneg %p510_p11  ;;  %p517_p2 = por %p516_p1, %p515_p0 }
  0x34   : > { %v222_v12 = vrot.slane %v221_v10, 2  ;;  %v216_v13 = vadd.f32 %v215_v11, %v214_v9  ;;  %p518_p3 = pnand %p517_p2, %p511_p12 }
  0x36   : > { %v223_v14 = vadd.f32 %v222_v12, %v221_v10  ;;  %v217_v15 = vrot.slane %v216_v13, 1 }
  0x38   : > { %v224_v16 = vrot.slane %v223_v14, 1  ;;  %v218_v17 = vadd.f32 %v217_v15, %v216_v13 }
  0x3a   : > { %v225_v18 = vadd.f32 %v224_v16, %v223_v14  ;;  %v227_v19 = vmul.f32 0.25, %v218_v17 }
  0x3c   : > { %v228_v20 = vmul.f32 0.25, %v225_v18 }
  0x3e   : > { %v231_v21 = vcombine.low %v227_v19, %v228_v20 }
  0x40   : > { %v233_v22 = vsub.f32 %v207_v3, %v231_v21 }
  0x42   : > { %v234_v23 = vmul.f32 %v233_v22, %v233_v22 }
  0x44   : > { %v236_v24 = vcombine.high %v234_v23, %v234_v23  ;;  %v238_v25 = vsel %vm211_vm0, %v234_v23, 0.0 }
  0x45   : > { %v239_v27 = vrot.slane %v238_v25, 4 }
  0x46   : > { %v245_v26 = vsel %vm211_vm0, %v236_v24, 0.0 }
  0x47   : > { %v246_v28 = vrot.slane %v245_v26, 4  ;;  %v240_v29 = vadd.f32 %v239_v27, %v238_v25 }
  0x49   : > { %v247_v30 = vadd.f32 %v246_v28, %v245_v26  ;;  %v241_v31 = vrot.slane %v240_v29, 2 }
  0x4b   : > { %v248_v32 = vrot.slane %v247_v30, 2  ;;  %v242_v33 = vadd.f32 %v241_v31, %v240_v29 }
  0x4d   : > { %v249_v34 = vadd.f32 %v248_v32, %v247_v30  ;;  %v243_v35 = vrot.slane %v242_v33, 1 }
  0x4f   : > { %v250_v36 = vrot.slane %v249_v34, 1  ;;  %v244_v37 = vadd.f32 %v243_v35, %v242_v33 }
  0x51   : > { %v251_v38 = vadd.f32 %v250_v36, %v249_v34  ;;  %v252_v39 = vmul.f32 0.25, %v244_v37 }
  0x53   : > { %v253_v40 = vmul.f32 0.25, %v251_v38  ;;  %v254_v41 = vadd.f32 1e-06, %v252_v39 }
  0x55   : > { %v255_v42 = vadd.f32 1e-06, %v253_v40  ;;  %476 = vrsqrt.f32 %v254_v41 }
  0x57   : > { %478 = vrsqrt.f32 %v255_v42 }
  0x62   : > { %v477_v46 = vpop.eup %476 }
  0x64   : > { %v479_v49 = vpop.eup %478 }
  0x65   : > { %v260_v51 = vcombine.low %v477_v46, %v479_v49 }
  0x67   : > { %v262_v53 = vmul.f32 %v260_v51, %v233_v22 }
  0xa7   : > { %v267_v52 = vpop.permute.xlu0 %266 }
  0xa8   : > { %v274_v54 = vrot.slane %v267_v52, %v273_v50 }
  0xaa   : > { %v276_v56 = vmul.f32 %v274_v54, %v262_v53 }
  0xab   : > { %v281_v55 = vpop.permute.xlu0 %280 }
  0xac   : > { %v288_v57 = vrot.slane %v281_v55, %v273_v50 }
  0xae   : > { %v290_v58 = vadd.f32 %v288_v57, %v276_v56 }
  0xb0   : > { %291 = vst [vmem:[%s204_s7] sm:$0xff] %v290_v58 }
  0xb1   : > { %521 = shalt.err (!%p518_p3)
}
  0xb2   : > { %s522_s28 = scalar_lea.hbm %s307_s11, 128  ;;  %s526_s30 = scalar_lea.hbm %s765_s3, 256 }
  0xb3   : > { %p523_p5 = scmp.ne.s32.totalorder %s307_s11, %s522_s28  ;;  %p527_p10 = scmp.lt.s32.totalorder %s307_s11, %s765_s3 }
  0xb4   : > { %p528_p4 = scmp.lt.s32.totalorder %s526_s30, %s522_s28 }
  0xb5   : > { %p524_p6 = pnand %p523_p5, %p665_p9 }
  0xb6   : > { %p529_p13 = por %p528_p4, %p527_p10 }
  0xb7   : > { %p525_p7 = pneg %p524_p6 }
  0xb9   : > { %p530_p8 = pnand %p529_p13, %p525_p7 }
  0xbb   : > { %533 = shalt.err (!%p530_p8)
}
  0xbc   : > { %412 = dma.vmem_to_hbm [thread:$0]  (%p665_p9), %s310_s8, 128, %s307_s11, %s293_s18  }
  0xbd PF: > { %s321_s6 = sand.u32 1, %s568_s12   ;;  %p771_p11 = scmp.ne.s32.totalorder %s769_s27, 0 }
  0xbe   : > { %p772_p12 = scmp.ge.s32.totalorder %s588_s17, 2  ;;  %s322_s24 = scalar_lea.sflag [#allocation4], %s321_s6 }
  0xc0   : > { %p419_p0 = pnand %p772_p12, %p771_p11 }
  0xc2   : > { %p420_p1 = pneg %p419_p0 }
  0xc4   : > { %563 = dma.done.wait (%p420_p1), %s322_s24, 128  }
  0xc5   : > { %565 = vsyncadd (%p420_p1), %s322_s24, 4294967168  ;;  %s19_s17 = sadd.s32 1, %s588_s17   ;;  %s773_s12 = smov %s572_s13 }
  0xc6   : > { %p16_p2 = scmp.ge.s32.totalorder %s19_s17, 4   ;;  %s774_s13 = smov %s576_s14 }
  0xc7   : > { %s775_s14 = smov %s670_s26  ;;  %s776_s15 = smov %s584_s16 }
  0xc8   : > { %s777_s16 = smov %s779_s20  ;;  %18 = sbr.rel (!%p16_p2) target bundleno = 6 (0x6), region = 77 }
  0xcd   :  { %327 = vsyncpa [#allocation3], 1 }
  0xce   :  { %329 = vsyncpa [#allocation3 + $0x1], 1 }
  0xcf   :  { %330 = vsyncpa [#allocation4], 1 }
  0xd0   :  { %332 = vsyncpa [#allocation4 + $0x1], 1 }

</bundles_post_ra>
